<compile_context>
chip_gen: v6e
topology: v6e:2x2x1
jax: 0.10.0
libtpu: 0.0.40
codegen_flags: <defaults>
</compile_context>

<pallas_src>
import jax
import jax.numpy as jnp
from jax.experimental import pallas as pl
from jax.experimental.pallas import tpu as pltpu


def residual_block_kernel(x_ref, w1_ref, t1_ref, w2_ref, t2_ref, o_ref):
    # --- Linear1 + BN1 (folded): bf16 MXU matmul, f32 accumulate ---
    h = jnp.dot(x_ref[...].astype(jnp.bfloat16), w1_ref[...],
                preferred_element_type=jnp.float32)              # [TM, D] f32
    h = jnp.maximum(h + t1_ref[...], 0.0)                        # shift + ReLU

    # --- Dropout(0.2): identity in eval mode ---

    # --- Linear2 + BN2 (folded) ---
    h2 = jnp.dot(h.astype(jnp.bfloat16), w2_ref[...],
                 preferred_element_type=jnp.float32)             # [TM, D] f32
    h2 = h2 + t2_ref[...]

    # --- residual add + ReLU ---
    # Re-read x from the ref near the use: keeps the x tile's live range short
    # so large TM does not force vreg spills across the two matmuls.
    out = jnp.maximum(h2 + x_ref[...].astype(jnp.float32), 0.0)
    o_ref[...] = out.astype(o_ref.dtype)


def residual_block(x, params, *, tm=512):
    """x: [N, D] (bf16 recommended). params: folded params from fold_params()."""
    N, D = x.shape

    # Tile the batch: multiple of 8, and keep >=2 grid steps when N allows it
    # (so the "parallel" axis can shard across v7x's two TensorCores).
    half = max(8, ((N // 2) // 8) * 8)
    tm = min(tm, half, N)
    grid = (pl.cdiv(N, tm),)

    row_spec = pl.BlockSpec((tm, D), lambda i: (i, 0))                    # tiled over batch
    w_spec = pl.BlockSpec((D, D), lambda i: (0, 0),
                          pipeline_mode=pl.Buffered(1))                   # resident weights
    v_spec = pl.BlockSpec((1, D), lambda i: (0, 0),
                          pipeline_mode=pl.Buffered(1))                   # resident shift rows

    act_bytes = jnp.dtype(x.dtype).itemsize
    # VMEM need: double-buffered x/out tiles + single-buffered bf16 weights + shifts.
    vmem_need = (2 * 2 * tm * D * act_bytes        # x + out, 2 buffers each
                 + 2 * D * D * 2                   # two bf16 weight matrices
                 + 2 * D * 4)                      # two f32 shift rows
    vmem_limit = int(min(max(2 * vmem_need, 4 * 1024 * 1024), 48 * 1024 * 1024))

    cost = pl.CostEstimate(
        flops=4 * N * D * D,                                   # two N x D x D matmuls
        transcendentals=0,
        bytes_accessed=2 * N * D * act_bytes + 2 * D * D * 2 + 2 * D * 4,
    )

    return pl.pallas_call(
        residual_block_kernel,
        out_shape=jax.ShapeDtypeStruct((N, D), x.dtype),
        grid=grid,
        in_specs=[row_spec, w_spec, v_spec, w_spec, v_spec],
        out_specs=row_spec,
        compiler_params=pltpu.CompilerParams(
            dimension_semantics=("parallel",),
            vmem_limit_bytes=vmem_limit,
        ),
        cost_estimate=cost,
    )(x, params["w1"], params["t1"], params["w2"], params["t2"])


def make_raw_params(key, dim):
    """Deterministic synthetic parameters matching ResidualBlock(dim) shapes."""
    ks = jax.random.split(key, 10)
    return {
        # Linear layers: weight [dim, dim], bias [dim]
        "w1": jax.random.normal(ks[0], (dim, dim), jnp.float32) * 0.05,
        "b1": jax.random.normal(ks[1], (dim,), jnp.float32) * 0.05,
        "w2": jax.random.normal(ks[2], (dim, dim), jnp.float32) * 0.05,
        "b2": jax.random.normal(ks[3], (dim,), jnp.float32) * 0.05,
        # BatchNorm1d affine params + running statistics
        "g1": 1.0 + 0.1 * jax.random.normal(ks[4], (dim,), jnp.float32),
        "be1": 0.1 * jax.random.normal(ks[5], (dim,), jnp.float32),
        "rm1": 0.1 * jax.random.normal(ks[6], (dim,), jnp.float32),
        "rv1": jnp.abs(1.0 + 0.1 * jax.random.normal(ks[7], (dim,), jnp.float32)),
        "g2": 1.0 + 0.1 * jax.random.normal(ks[8], (dim,), jnp.float32),
        "be2": 0.1 * jax.random.normal(ks[9], (dim,), jnp.float32),
        "rm2": jnp.zeros((dim,), jnp.float32),
        "rv2": jnp.ones((dim,), jnp.float32),
    }


def fold_params(raw, eps=1e-5):
    """Fold Linear bias + eval-mode BN into the (transposed) weights.

    y = BN(x @ W^T + b) = x @ (W^T * s) + (b*s + beta - rm*s),  s = gamma/sqrt(rv+eps)
    Weights are stored bf16 for the MXU; shift rows stay f32.
    """
    dim = raw["w1"].shape[0]
    s1 = raw["g1"] / jnp.sqrt(raw["rv1"] + eps)
    t1 = raw["b1"] * s1 + raw["be1"] - raw["rm1"] * s1
    s2 = raw["g2"] / jnp.sqrt(raw["rv2"] + eps)
    t2 = raw["b2"] * s2 + raw["be2"] - raw["rm2"] * s2
    return {
        "w1": (raw["w1"].T * s1[None, :]).astype(jnp.bfloat16),
        "t1": t1.reshape(1, dim).astype(jnp.float32),
        "w2": (raw["w2"].T * s2[None, :]).astype(jnp.bfloat16),
        "t2": t2.reshape(1, dim).astype(jnp.float32),
    }


def residual_block_ref(x, raw, eps=1e-5):
    """Pure-JAX f32 reference of the module's eval-mode forward (unfolded)."""
    h = x @ raw["w1"].T + raw["b1"]
    h = (h - raw["rm1"]) / jnp.sqrt(raw["rv1"] + eps) * raw["g1"] + raw["be1"]
    h = jnp.maximum(h, 0.0)
    h2 = h @ raw["w2"].T + raw["b2"]
    h2 = (h2 - raw["rm2"]) / jnp.sqrt(raw["rv2"] + eps) * raw["g2"] + raw["be2"]
    return jnp.maximum(h2 + x, 0.0)


if __name__ == "__main__":
    key = jax.random.PRNGKey(0)
    k_x, k_p = jax.random.split(key)

    batch, dim = 256, 128            # lane-dense: dim multiple of 128, batch multiple of 8
    x_f32 = jax.random.normal(k_x, (batch, dim), jnp.float32)
    raw = make_raw_params(k_p, dim)
    params = fold_params(raw)

    # bf16 at the HBM boundary (input + output); kernel accumulates in f32.
    x_bf16 = x_f32.astype(jnp.bfloat16)
    out = residual_block(x_bf16, params, tm=512)   # tm clamped to 128 -> grid=(2,)
    out = jax.block_until_ready(out)

    ref = residual_block_ref(x_f32, raw)
    assert out.shape == (batch, dim)
    assert out.dtype == jnp.bfloat16
    # bf16 weights/activations at the HBM boundary + bf16 output rounding
    # -> loosened tolerance vs the f32 reference.
    out_f32 = out.astype(jnp.float32)
    assert jnp.allclose(out_f32, ref, atol=8e-2, rtol=5e-2), (
        float(jnp.max(jnp.abs(out_f32 - ref))))

    print("KERNEL_OK")
</pallas_src>

<mosaic_0001>
module attributes {stable_mosaic.version = 11 : i64} {
  func.func @residual_block_kernel(%arg0: i32, %arg1: memref<128x128xbf16, #tpu.memory_space<vmem>>, %arg2: memref<128x128xbf16, #tpu.memory_space<vmem>>, %arg3: memref<1x128xf32, #tpu.memory_space<vmem>>, %arg4: memref<128x128xbf16, #tpu.memory_space<vmem>>, %arg5: memref<1x128xf32, #tpu.memory_space<vmem>>, %arg6: memref<128x128xbf16, #tpu.memory_space<vmem>>) attributes {dimension_semantics = [#tpu.dimension_semantics<parallel>], iteration_bounds = array<i64: 2>, scalar_prefetch = 0 : i64, scratch_operands = 0 : i64, tpu.core_type = #tpu.core_type<tc>, window_params = [{transform_indices = @transform_0, window_bounds = array<i64: 128, 128>}, {pipeline_mode = #tpu.pipeline_mode<synchronous>, transform_indices = @transform_1, window_bounds = array<i64: 128, 128>}, {pipeline_mode = #tpu.pipeline_mode<synchronous>, transform_indices = @transform_2, window_bounds = array<i64: 1, 128>}, {pipeline_mode = #tpu.pipeline_mode<synchronous>, transform_indices = @transform_3, window_bounds = array<i64: 128, 128>}, {pipeline_mode = #tpu.pipeline_mode<synchronous>, transform_indices = @transform_4, window_bounds = array<i64: 1, 128>}, {transform_indices = @transform_5, window_bounds = array<i64: 128, 128>}]} {
    %c0 = arith.constant 0 : index
    %c0_0 = arith.constant 0 : index
    %0 = vector.load %arg1[%c0, %c0_0] : memref<128x128xbf16, #tpu.memory_space<vmem>>, vector<128x128xbf16>
    %c0_1 = arith.constant 0 : index
    %c0_2 = arith.constant 0 : index
    %1 = vector.load %arg2[%c0_1, %c0_2] : memref<128x128xbf16, #tpu.memory_space<vmem>>, vector<128x128xbf16>
    %cst = arith.constant dense<0.000000e+00> : vector<128x128xf32>
    %2 = tpu.matmul %0, %1, %cst {dimension_numbers = #tpu.dot_dimension_numbers<[1], [0], [0], [1], [0, 0, 1, 1], [], []>} : vector<128x128xbf16>, vector<128x128xbf16>, vector<128x128xf32> -> vector<128x128xf32>
    %c0_3 = arith.constant 0 : index
    %c0_4 = arith.constant 0 : index
    %3 = vector.load %arg3[%c0_3, %c0_4] : memref<1x128xf32, #tpu.memory_space<vmem>>, vector<1x128xf32>
    %4 = vector.broadcast %3 : vector<1x128xf32> to vector<128x128xf32>
    %5 = arith.addf %2, %4 : vector<128x128xf32>
    %cst_5 = arith.constant 0.000000e+00 : f32
    %6 = vector.broadcast %cst_5 : f32 to vector<128x128xf32>
    %7 = arith.maximumf %5, %6 : vector<128x128xf32>
    %8 = arith.truncf %7 : vector<128x128xf32> to vector<128x128xbf16>
    %c0_6 = arith.constant 0 : index
    %c0_7 = arith.constant 0 : index
    %9 = vector.load %arg4[%c0_6, %c0_7] : memref<128x128xbf16, #tpu.memory_space<vmem>>, vector<128x128xbf16>
    %cst_8 = arith.constant dense<0.000000e+00> : vector<128x128xf32>
    %10 = tpu.matmul %8, %9, %cst_8 {dimension_numbers = #tpu.dot_dimension_numbers<[1], [0], [0], [1], [0, 0, 1, 1], [], []>} : vector<128x128xbf16>, vector<128x128xbf16>, vector<128x128xf32> -> vector<128x128xf32>
    %c0_9 = arith.constant 0 : index
    %c0_10 = arith.constant 0 : index
    %11 = vector.load %arg5[%c0_9, %c0_10] : memref<1x128xf32, #tpu.memory_space<vmem>>, vector<1x128xf32>
    %12 = vector.broadcast %11 : vector<1x128xf32> to vector<128x128xf32>
    %13 = arith.addf %10, %12 : vector<128x128xf32>
    %c0_11 = arith.constant 0 : index
    %c0_12 = arith.constant 0 : index
    %14 = vector.load %arg1[%c0_11, %c0_12] : memref<128x128xbf16, #tpu.memory_space<vmem>>, vector<128x128xbf16>
    %15 = arith.extf %14 : vector<128x128xbf16> to vector<128x128xf32>
    %16 = arith.addf %13, %15 : vector<128x128xf32>
    %cst_13 = arith.constant 0.000000e+00 : f32
    %17 = vector.broadcast %cst_13 : f32 to vector<128x128xf32>
    %18 = arith.maximumf %16, %17 : vector<128x128xf32>
    %19 = arith.truncf %18 : vector<128x128xf32> to vector<128x128xbf16>
    %c0_14 = arith.constant 0 : index
    %c0_15 = arith.constant 0 : index
    %20 = vector.load %arg6[%c0_14, %c0_15] : memref<128x128xbf16, #tpu.memory_space<vmem>>, vector<128x128xbf16>
    tpu.vector_store %arg6[%c0_14, %c0_15], %19 {strides = array<i32>} : memref<128x128xbf16, #tpu.memory_space<vmem>>, vector<128x128xbf16>,
    return
  }
  func.func @transform_0(%arg0: i32) -> (i32, i32) {
    %c0_i32 = arith.constant 0 : i32
    %c0_i32_0 = arith.constant 0 : i32
    return %arg0, %c0_i32 : i32, i32
  }
  func.func @transform_1(%arg0: i32) -> (i32, i32) {
    %c0_i32 = arith.constant 0 : i32
    %c0_i32_0 = arith.constant 0 : i32
    %c0_i32_1 = arith.constant 0 : i32
    return %c0_i32, %c0_i32_0 : i32, i32
  }
  func.func @transform_2(%arg0: i32) -> (i32, i32) {
    %c0_i32 = arith.constant 0 : i32
    %c0_i32_0 = arith.constant 0 : i32
    %c0_i32_1 = arith.constant 0 : i32
    return %c0_i32, %c0_i32_0 : i32, i32
  }
  func.func @transform_3(%arg0: i32) -> (i32, i32) {
    %c0_i32 = arith.constant 0 : i32
    %c0_i32_0 = arith.constant 0 : i32
    %c0_i32_1 = arith.constant 0 : i32
    return %c0_i32, %c0_i32_0 : i32, i32
  }
  func.func @transform_4(%arg0: i32) -> (i32, i32) {
    %c0_i32 = arith.constant 0 : i32
    %c0_i32_0 = arith.constant 0 : i32
    %c0_i32_1 = arith.constant 0 : i32
    return %c0_i32, %c0_i32_0 : i32, i32
  }
  func.func @transform_5(%arg0: i32) -> (i32, i32) {
    %c0_i32 = arith.constant 0 : i32
    %c0_i32_0 = arith.constant 0 : i32
    return %arg0, %c0_i32 : i32, i32
  }
}

</mosaic_0001>

<bundles_post_ra>
// kernel: tpu_custom_call.1
= control target key start
LH: loop header
LB: loop body
LE: loop exit
PB: predicated region body
PF: predicated region fallthrough
CT: control target
= control target key end

     0   :  { %10 = vsyncpa [#allocation3], 0  ;;  %s1731_s0 = inlined_call_operand.hbm [shape: bf16[256,128], index: 0, kind: input, shape index: {}]   ;;  %s1732_s1 = inlined_call_operand.hbm [shape: bf16[128,128], index: 1, kind: input, shape index: {}]   ;;  %s1733_s2 = inlined_call_operand.vmem [shape: f32[1,128], index: 2, kind: input, shape index: {}]   ;;  %s1734_s3 = inlined_call_operand.hbm [shape: bf16[128,128], index: 3, kind: input, shape index: {}]   ;;  %s1735_s4 = inlined_call_operand.vmem [shape: f32[1,128], index: 4, kind: input, shape index: {}]   ;;  %s1736_s5 = inlined_call_operand.hbm [shape: bf16[256,128], index: 5, kind: output, shape index: {}]  }
   0x1   :  { %12 = vsyncpa [#allocation3 + $0x1], 0 }
   0x2   :  { %13 = vsyncpa [#allocation6], 0 }
   0x3   :  { %14 = vsyncpa [#allocation4], 0 }
   0x4   :  { %16 = vsyncpa [#allocation4 + $0x1], 0  ;;  %s1445_s18 = smov 0   ;;  %s1447_s19 = smov 0  }
   0x5   :  { %s1449_s20 = smov 0   ;;  %s1451_s21 = smov 0  }
   0x6 LB: > { %s1466_s22 = sadd.s32 4294967295, %s1405_s21   ;;  %s933_s23 = sadd.s32 4294967294, %s1405_s21   ;;  %s1405_s21 = sphi %s1451_s21, %s1759_s21   ;;  %s1401_s20 = sphi %s1449_s20, %s1758_s20   ;;  %s1397_s19 = sphi %s1447_s19, %s1757_s19   ;;  %s1393_s18 = sphi %s1445_s18, %s1756_s18  }
   0x7   : > { %p42_p0 = scmp.ne.s32.totalorder %s1397_s19, %s1393_s18  ;;  %p1737_p1 = scmp.eq.s32.totalorder %s1466_s22, 0 }
   0x8   : > { %p150_p2 = scmp.eq.s32.totalorder %s1466_s22, 1  ;;  %p156_p3 = scmp.eq.s32.totalorder %s933_s23, 1 }
   0x9   : > { %p1475_p4 = por %p1737_p1, %p42_p0  ;;  %p934_p5 = scmp.ge.s32.totalorder %s1405_s21, 1 }
   0xa   : > { %p1480_p6 = por %p156_p3, %p42_p0  ;;  %p163_p7 = scmp.lt.s32.totalorder %s1405_s21, 3 }
   0xb   : > { %s1742_s24 = scalar_select %p1475_p4, 1, 0 }
   0xc   : > { %s1743_s25 = scalar_select %p1480_p6, 1, 0 }
   0xd   : > { %p1485_p8 = pnand %p934_p5, %p163_p7  ;;  %s1407_s27 = smov [#allocation5]  }
   0xe   : > { %s175_s28 = sshll.u32 %s1407_s27, 4  ;;  %s1408_s30 = smov [#allocation7]   ;;  %s176_s28 = int_to_ptr.vmem [resolvable:$true] %s175_s28 }
   0xf   : > { %s1744_s26 = scalar_select %p1485_p8, 1, 0 }
  0x10   : > { %p1166_p9 = pneg %p1485_p8  ;;  %s191_s6 = sshll.u32 %s1408_s30, 4  ;;  %s192_s6 = int_to_ptr.vmem [resolvable:$true] %s191_s6 }
  0x11   : > { %s1268_s7 = scalar_lea.vmem %s176_s28, 1024  ;;  %p1276_p5 = scmp.lt.s32.totalorder %s176_s28, %s176_s28 }
  0x12   : > { %p1494_p11 = pnand %p1166_p9, %p1737_p1  ;;  %p1269_p13 = scmp.ne.s32.totalorder %s176_s28, %s1268_s7 }
  0x13   : > { %p1277_p7 = scmp.lt.s32.totalorder %s1268_s7, %s1268_s7 }
  0x14   : > { %p1259_p12 = pneg %p1494_p11 }
  0x15   : > { %p1278_p10 = por %p1277_p7, %p1276_p5 }
  0x16   : > { %p1271_p0 = pnand %p1269_p13, %p1259_p12 }
  0x18   : > { %p1272_p3 = pneg %p1271_p0 }
  0x1a   : > { %p1279_p9 = pnand %p1278_p10, %p1272_p3 }
  0x1c   : > { %1282 = shalt.err (!%p1279_p9)
}
  0x1d   : > { %s1738_s8 = smov 64   ;;  %s1410_s9 = smov 4  }
  0x1e   : > { %1169 = dma.hbm_to_vmem [thread:$0]  (!%p1494_p11), %s1732_s1, 1024, %s176_s28, [#allocation6], %s1738_s8, %s1738_s8, %s1410_s9  }
  0x1f   : > { %s1294_s12 = scalar_lea.vmem %s192_s6, 1024  ;;  %p1302_p10 = scmp.lt.s32.totalorder %s192_s6, %s192_s6 }
  0x20   : > { %p1295_p13 = scmp.ne.s32.totalorder %s192_s6, %s1294_s12  ;;  %p1303_p3 = scmp.lt.s32.totalorder %s1294_s12, %s1294_s12 }
  0x22   : > { %p1297_p0 = pnand %p1295_p13, %p1259_p12  ;;  %p1304_p7 = por %p1303_p3, %p1302_p10 }
  0x24   : > { %p1298_p5 = pneg %p1297_p0 }
  0x26   : > { %p1305_p9 = pnand %p1304_p7, %p1298_p5 }
  0x28   : > { %1308 = shalt.err (!%p1305_p9)
}
  0x29   : > { %1172 = dma.hbm_to_vmem [thread:$0]  (!%p1494_p11), %s1734_s3, 1024, %s192_s6, [#allocation6], %s1738_s8, %s1738_s8, %s1410_s9  }
  0x2a   : > { %s1523_s15 = sadd.s32 1, %s1405_s21   ;;  %s29_s16 = sadd.s32 1, %s1401_s20 }
  0x2b   : > { %s26_s17 = ssub.s32 %s1405_s21, %s1523_s15  ;;  %p36_p12 = scmp.ne.s32.totalorder %s1401_s20, %s1397_s19 }
  0x2c   : > { %p27_p13 = scmp.eq.s32.totalorder %s26_s17, 0  ;;  %p37_p0 = scmp.eq.s32.totalorder %s1405_s21, 0 }
  0x2d   : > { %p1533_p5 = por %p150_p2, %p36_p12  ;;  %p1183_p10 = scmp.lt.s32.totalorder %s1405_s21, 2 }
  0x2e   : > { %s1539_s27 = scalar_select %p27_p13, %s1401_s20, %s29_s16  }
  0x2f   : > { %s1746_s23 = scalar_select %p1533_p5, 1, 0 }
  0x30   : > { %p38_p3 = por %p37_p0, %p36_p12  ;;  %s208_s28 = sand.u32 1, %s1401_s20  }
  0x31   : > { %s938_s29 = sshll.u32 %s208_s28, 6  ;;  %s993_s30 = sshll.u32 %s1405_s21, 10 }
  0x32   : > { %s1546_s10 = scalar_lea.hbm %s1731_s0, %s993_s30  ;;  %s212_s11 = scalar_lea.vmem [#allocation2], %s938_s29 }
  0x33   : > { %s219_s12 = sshll.u32 %s212_s11, 4  ;;  %p1550_p2 = pnand %p1183_p10, %p38_p3  ;;  %s1548_s12 = int_to_ptr.vmem [resolvable:$true] %s219_s12 }
  0x34   : > { %s1554_s14 = scalar_lea.sflag [#allocation3], %s208_s28  ;;  %s1309_s16 = scalar_lea.hbm %s1546_s10, 1024 }
  0x35   : > { %p1310_p11 = scmp.ne.s32.totalorder %s1546_s10, %s1309_s16  ;;  %p1311_p7 = pneg %p1550_p2 }
  0x36   : > { %s1314_s29 = scalar_lea.hbm %s1731_s0, 2048  ;;  %p1315_p13 = scmp.lt.s32.totalorder %s1546_s10, %s1731_s0 }
  0x37   : > { %p1312_p9 = pnand %p1311_p7, %p1310_p11  ;;  %p1316_p0 = scmp.lt.s32.totalorder %s1314_s29, %s1309_s16 }
  0x39   : > { %p1313_p12 = pneg %p1312_p9  ;;  %p1317_p10 = por %p1316_p0, %p1315_p13 }
  0x3b   : > { %p1318_p3 = pnand %p1317_p10, %p1313_p12 }
  0x3d   : > { %1321 = shalt.err (!%p1318_p3)
}
  0x3e   : > { %s1322_s28 = scalar_lea.vmem %s1548_s12, 1024  ;;  %s1411_s11 = smov [#allocation2]  }
  0x3f   : > { %p1323_p1 = scmp.ne.s32.totalorder %s1548_s12, %s1322_s28  ;;  %s1327_s8 = sshll.u32 %s1411_s11, 4  ;;  %s1328_s8 = int_to_ptr.vmem [resolvable:$false] %s1327_s8 }
  0x40   : > { %s1329_s17 = scalar_lea.vmem %s1328_s8, 2048  ;;  %p1330_p9 = scmp.lt.s32.totalorder %s1548_s12, %s1328_s8 }
  0x41   : > { %p1325_p6 = pnand %p1323_p1, %p1311_p7  ;;  %p1331_p5 = scmp.lt.s32.totalorder %s1329_s17, %s1322_s28 }
  0x43   : > { %p1326_p11 = pneg %p1325_p6  ;;  %p1332_p4 = por %p1331_p5, %p1330_p9 }
  0x45   : > { %p1333_p8 = pnand %p1332_p4, %p1326_p11 }
  0x47   : > { %1336 = shalt.err (!%p1333_p8)
}
  0x48   : > { %s1748_s16 = smov 64   ;;  %p1749_p1 = scmp.ne.s32.totalorder %s1744_s26, 0 }
  0x49   : > { %1176 = dma.hbm_to_vmem [thread:$0]  (!%p1550_p2), %s1546_s10, 1024, %s1548_s12, %s1554_s14, %s1748_s16, %s1748_s16, %s1410_s9  }
  0x4a   : > { %231 = sbr.rel (%p1749_p1) target bundleno = 567 (0x237), region = 40  ;;  %s1581_s30 = sand.u32 (!%p1749_p1), 1, %s1397_s19  }
  0x4b   : > { %s942_s8 = sshll.u32 (!%p1749_p1), %s1581_s30, 6  ;;  %s234_s29 = scalar_lea.sflag (!%p1749_p1), [#allocation3], %s1581_s30 }
  0x4c   : > { %s1587_s13 = scalar_lea.vmem (!%p1749_p1), [#allocation2], %s942_s8  ;;  %p1750_p4 = scmp.ne.s32.totalorder (!%p1749_p1), %s1742_s24, 0 }
  0x4f   : > { %1380 = dma.done.wait (%p1750_p4), %s234_s29, 1024  }
  0x50   : > { %1382 = vsyncadd (%p1750_p4), %s234_s29, 4294966272  ;;  %p1751_p6 = scmp.eq.s32.totalorder %s1466_s22, 0 }
  0x52   : > { %1384 = dma.done.wait (%p1751_p6), [#allocation6], 2048   ;;  %p1752_p8 = pmov %p1751_p6 }
  0x53   : > { %v1225_v0 = vld [vmem:[#allocation5 + $0x38] sm:$0xff]   ;;  %v1226_v1 = vld [vmem:[#allocation5 + $0x30] sm:$0xff]   ;;  %v1227_v2 = vld [vmem:[#allocation5 + $0x28] sm:$0xff]   ;;  %s1652_s12 = scalar_lea.vmem [#allocation8], %s942_s8  ;;  %s1010_s14 = sshll.u32 %s1466_s22, 10 }
  0x54   : > { %1386 = vsyncadd (%p1752_p8), [#allocation6], 4294965248  ;;  %1090 = vmatprep.subr.bf16.mxu0 %v1225_v0  ;;  %v1228_v3 = vld [vmem:[#allocation5 + $0x20] sm:$0xff]   ;;  %v1229_v5 = vld [vmem:[#allocation5 + $0x18] sm:$0xff]   ;;  %s841_s6 = sshll.u32 %s1652_s12, 4  ;;  %s1684_s11 = scalar_lea.hbm %s1736_s5, %s1010_s14  ;;  %s1686_s6 = int_to_ptr.vmem [resolvable:$true] %s841_s6 }
  0x55   : > { %1091 = vmatpush3.bf16.msra.mxu0 %v1225_v0  ;;  %v1598_v4 = vld [vmem:[%s1587_s13] sm:$0xff]   ;;  %v1241_v6 = vld [vmem:[#allocation7 + $0x38] sm:$0xff]   ;;  %v1242_v7 = vld [vmem:[#allocation7 + $0x30] sm:$0xff]   ;;  %s828_s17 = scalar_lea.sflag [#allocation4], %s1581_s30  ;;  %s1337_s16 = scalar_lea.vmem %s1686_s6, 1024 }
  0x56   : > { %1092 = vmatprep.subr.bf16.mxu0 %v1226_v1  ;;  %1106 = vmatprep.mubr.bf16.mxu0 %v1598_v4  ;;  %v1230_v8 = vld [vmem:[#allocation5 + $0x10] sm:$0xff]   ;;  %v1243_v9 = vld [vmem:[#allocation7 + $0x28] sm:$0xff]   ;;  %v1244_v10 = vld [vmem:[#allocation7 + $0x20] sm:$0xff]   ;;  %p1338_p5 = scmp.ne.s32.totalorder %s1686_s6, %s1337_s16  ;;  %p1753_p2 = scmp.ne.s32.totalorder %s1746_s23, 0 }
  0x57   : > { %1122 = vmatprep.subr.bf16.mxu1 %v1241_v6  ;;  %v1231_v11 = vld [vmem:[#allocation5 + $0x8] sm:$0xff]   ;;  %v1245_v12 = vld [vmem:[#allocation7 + $0x18] sm:$0xff]   ;;  %v1232_v13 = vld [vmem:[#allocation5] sm:$0xff]   ;;  %s1412_s22 = smov [#allocation8]  }
  0x58   : > { %1123 = vmatpush3.bf16.msra.mxu1 %v1241_v6  ;;  %v1602_v14 = vld [vmem:[%s1587_s13 + $0x8] sm:$0xff]   ;;  %v1605_v15 = vld [vmem:[%s1587_s13 + $0x10] sm:$0xff]   ;;  %v1610_v16 = vld [vmem:[%s1587_s13 + $0x18] sm:$0xff]   ;;  %p1339_p7 = pnand %p1338_p5, %p1753_p2  ;;  %s1341_s8 = sshll.u32 %s1412_s22, 4  ;;  %s1342_s8 = int_to_ptr.vmem [resolvable:$false] %s1341_s8 }
  0x59   : > { %1093 = vmatpush3.bf16.msra.mxu0 %v1226_v1  ;;  %1124 = vmatprep.subr.bf16.mxu1 %v1242_v7  ;;  %v1613_v17 = vld [vmem:[%s1587_s13 + $0x20] sm:$0xff]   ;;  %v1618_v18 = vld [vmem:[%s1587_s13 + $0x28] sm:$0xff]   ;;  %v1621_v19 = vld [vmem:[%s1587_s13 + $0x30] sm:$0xff]   ;;  %s1343_s29 = scalar_lea.vmem %s1342_s8, 2048  ;;  %p1344_p13 = scmp.lt.s32.totalorder %s1686_s6, %s1342_s8 }
  0x5a   : > { %1094 = vmatprep.subr.bf16.mxu0 %v1227_v2  ;;  %v1626_v20 = vld [vmem:[%s1587_s13 + $0x38] sm:$0xff]   ;;  %v1246_v21 = vld [vmem:[#allocation7 + $0x10] sm:$0xff]   ;;  %v1247_v22 = vld [vmem:[#allocation7 + $0x8] sm:$0xff]   ;;  %p1340_p12 = pneg %p1339_p7  ;;  %p1345_p0 = scmp.lt.s32.totalorder %s1343_s29, %s1337_s16 }
  0x5b   : > { %v1248_v23 = vld [vmem:[#allocation7] sm:$0xff]  }
  0x5c   : > { %1125 = vmatpush3.bf16.msra.mxu1 %v1242_v7  ;;  %v946_v26 = vld [vmem:[%s1733_s2] ss:$0 sm:$0xff]  ;;  %p1346_p10 = por %p1345_p0, %p1344_p13 }
  0x5d   : > { %1095 = vmatpush3.bf16.msra.mxu0 %v1227_v2  ;;  %1126 = vmatprep.subr.bf16.mxu1 %v1243_v9 }
  0x5e   : > { %1096 = vmatprep.subr.bf16.mxu0 %v1228_v3  ;;  %p1347_p3 = pnand %p1346_p10, %p1340_p12 }
  0x60   : > { %1127 = vmatpush3.bf16.msra.mxu1 %v1243_v9 }
  0x61   : > { %1097 = vmatpush3.bf16.msra.mxu0 %v1228_v3  ;;  %1128 = vmatprep.subr.bf16.mxu1 %v1244_v10 }
  0x62   : > { %1098 = vmatprep.subr.bf16.mxu0 %v1229_v5 }
  0x64   : > { %1129 = vmatpush3.bf16.msra.mxu1 %v1244_v10 }
  0x65   : > { %1099 = vmatpush3.bf16.msra.mxu0 %v1229_v5  ;;  %1130 = vmatprep.subr.bf16.mxu1 %v1245_v12 }
  0x66   : > { %1100 = vmatprep.subr.bf16.mxu0 %v1230_v8 }
  0x68   : > { %1131 = vmatpush3.bf16.msra.mxu1 %v1245_v12 }
  0x69   : > { %1101 = vmatpush3.bf16.msra.mxu0 %v1230_v8  ;;  %1132 = vmatprep.subr.bf16.mxu1 %v1246_v21 }
  0x6a   : > { %1102 = vmatprep.subr.bf16.mxu0 %v1231_v11 }
  0x6c   : > { %1133 = vmatpush3.bf16.msra.mxu1 %v1246_v21 }
  0x6d   : > { %1103 = vmatpush3.bf16.msra.mxu0 %v1231_v11  ;;  %1134 = vmatprep.subr.bf16.mxu1 %v1247_v22 }
  0x6e   : > { %1104 = vmatprep.subr.bf16.mxu0 %v1232_v13 }
  0x70   : > { %1135 = vmatpush3.bf16.msra.mxu1 %v1247_v22 }
  0x71   : > { %1105 = vmatpush3.bf16.msra.mxu0 %v1232_v13  ;;  %1136 = vmatprep.subr.bf16.mxu1 %v1248_v23 }
  0x74   : > { %1107 = vmatmul.mubr.bf16.vlgmr.msra.gmra.mxu0 %v1602_v14  ;;  %1137 = vmatpush3.bf16.msra.mxu1 %v1248_v23 }
  0x75   : > { %1110 = vmatprep.mubr.bf16.mxu0 %v1605_v15 }
  0x7c   : > { %1111 = vmatmul.mubr.bf16.gmra.mxu0 %v1610_v16 }
  0x7d   : > { %1114 = vmatprep.mubr.bf16.mxu0 %v1613_v17 }
  0x84   : > { %1115 = vmatmul.mubr.bf16.gmra.mxu0 %v1618_v18 }
  0x85   : > { %1118 = vmatprep.mubr.bf16.mxu0 %v1621_v19 }
  0x8c   : > { %1119 = vmatmul.mubr.bf16.gmra.mxu0 %v1626_v20 }
 0x134   : > { %v1108_v24 = vpop.f32.mrf.mxu0 }
 0x135   : > { %v453_v30 = vadd.f32 %v1108_v24, %v946_v26 }
 0x136   : > { %v444_v25 = vpop.f32.mrf.mxu0 }
 0x137   : > { %v445_v28 = vadd.f32 %v946_v26, %v444_v25  ;;  %v509_v37 = vmax.f32 %v453_v30, 0.0  ;;  %v1635_v25 = vld [vmem:[%s1735_s4] ss:$0 sm:$0xff] }
 0x138   : > { %v1109_v27 = vpop.f32.mrf.mxu0 }
 0x139   : > { %v456_v29 = vadd.f32 %v1109_v27, %v946_v26  ;;  %v507_v35 = vmax.f32 %v445_v28, 0.0 }
 0x13a   : > { %v447_v31 = vpop.f32.mrf.mxu0 }
 0x13b   : > { %v448_v32 = vadd.f32 %v946_v26, %v447_v31  ;;  %v510_v33 = vmax.f32 %v456_v29, 0.0  ;;  %v701_v29 = vunpack.c.l.bf16 %v1602_v14 }
 0x13c   : > { %v1112_v34 = vpop.f32.mrf.mxu0 }
 0x13d   : > { %v508_v36 = vmax.f32 %v448_v32, 0.0  ;;  %v524_v40 = vpack.c.bf16 %v510_v33, %v509_v37  ;;  %v469_v44 = vadd.f32 %v1112_v34, %v946_v26  ;;  %v702_v32 = vunpack.c.h.bf16 %v1602_v14 }
 0x13e   : > { %v460_v38 = vpop.f32.mrf.mxu0  ;;  %v700_v34 = vunpack.c.h.bf16 %v1598_v4 }
 0x13f   : > { %v523_v39 = vpack.c.bf16 %v508_v36, %v507_v35  ;;  %v461_v42 = vadd.f32 %v946_v26, %v460_v38  ;;  %v513_v51 = vmax.f32 %v469_v44, 0.0 }
 0x140   : > { %v1113_v41 = vpop.f32.mrf.mxu0 }
 0x141   : > { %v472_v43 = vadd.f32 %v1113_v41, %v946_v26  ;;  %1138 = vmatprep.mubr.bf16.mxu1 %v523_v39  ;;  %v511_v49 = vmax.f32 %v461_v42, 0.0  ;;  %v705_v42 = vunpack.c.l.bf16 %v1610_v16 }
 0x142   : > { %v463_v45 = vpop.f32.mrf.mxu0  ;;  %1139 = vmatmul.mubr.bf16.vlgmr.msra.gmra.mxu1 %v524_v40 }
 0x143   : > { %v464_v46 = vadd.f32 %v946_v26, %v463_v45  ;;  %v514_v47 = vmax.f32 %v472_v43, 0.0 }
 0x144   : > { %v1116_v48 = vpop.f32.mrf.mxu0 }
 0x145   : > { %v512_v50 = vmax.f32 %v464_v46, 0.0  ;;  %v526_v54 = vpack.c.bf16 %v514_v47, %v513_v51  ;;  %v485_v58 = vadd.f32 %v1116_v48, %v946_v26  ;;  %v706_v47 = vunpack.c.h.bf16 %v1610_v16 }
 0x146   : > { %v476_v52 = vpop.f32.mrf.mxu0 }
 0x147   : > { %v525_v53 = vpack.c.bf16 %v512_v50, %v511_v49  ;;  %v477_v56 = vadd.f32 %v946_v26, %v476_v52  ;;  %v517_v1 = vmax.f32 %v485_v58, 0.0 }
 0x148   : > { %v1117_v55 = vpop.f32.mrf.mxu0 }
 0x149   : > { %v488_v57 = vadd.f32 %v1117_v55, %v946_v26  ;;  %1142 = vmatprep.mubr.bf16.mxu1 %v525_v53  ;;  %v515_v63 = vmax.f32 %v477_v56, 0.0  ;;  %v704_v56 = vunpack.c.h.bf16 %v1605_v15 }
 0x14a   : > { %v479_v59 = vpop.f32.mrf.mxu0  ;;  %1143 = vmatmul.mubr.bf16.gmra.mxu1 %v526_v54 }
 0x14b   : > { %v480_v60 = vadd.f32 %v946_v26, %v479_v59  ;;  %v518_v61 = vmax.f32 %v488_v57, 0.0 }
 0x14c   : > { %v1120_v62 = vpop.f32.mrf.mxu0 }
 0x14d   : > { %v516_v0 = vmax.f32 %v480_v60, 0.0  ;;  %v528_v5 = vpack.c.bf16 %v518_v61, %v517_v1  ;;  %v501_v9 = vadd.f32 %v1120_v62, %v946_v26  ;;  %v709_v61 = vunpack.c.l.bf16 %v1618_v18 }
 0x14e   : > { %v492_v2 = vpop.f32.mrf.mxu0 }
 0x14f   : > { %v527_v3 = vpack.c.bf16 %v516_v0, %v515_v63  ;;  %v493_v7 = vadd.f32 %v946_v26, %v492_v2  ;;  %v521_v22 = vmax.f32 %v501_v9, 0.0 }
 0x150   : > { %v1121_v6 = vpop.f32.mrf.mxu0 }
 0x151   : > { %v504_v8 = vadd.f32 %v1121_v6, %v946_v26  ;;  %1146 = vmatprep.mubr.bf16.mxu1 %v527_v3  ;;  %v519_v13 = vmax.f32 %v493_v7, 0.0  ;;  %v707_v3 = vunpack.c.l.bf16 %v1613_v17 }
 0x152   : > { %v495_v10 = vpop.f32.mrf.mxu0  ;;  %1147 = vmatmul.mubr.bf16.gmra.mxu1 %v528_v5 }
 0x153   : > { %v496_v11 = vadd.f32 %v946_v26, %v495_v10  ;;  %v522_v12 = vmax.f32 %v504_v8, 0.0  ;;  %v699_v26 = vunpack.c.l.bf16 %v1598_v4  ;;  %v703_v4 = vunpack.c.l.bf16 %v1605_v15 }
 0x154   : > { %v710_v15 = vunpack.c.h.bf16 %v1618_v18 }
 0x155   : > { %v520_v21 = vmax.f32 %v496_v11, 0.0  ;;  %v530_v24 = vpack.c.bf16 %v522_v12, %v521_v22 }
 0x157   : > { %v529_v23 = vpack.c.bf16 %v520_v21, %v519_v13  ;;  %v708_v13 = vunpack.c.h.bf16 %v1613_v17  ;;  %v714_v17 = vunpack.c.h.bf16 %v1626_v20 }
 0x159   : > { %1150 = vmatprep.mubr.bf16.mxu1 %v529_v23 }
 0x15a   : > { %1151 = vmatmul.mubr.bf16.gmra.mxu1 %v530_v24 }
 0x202   : > { %v1140_v27 = vpop.f32.mrf.mxu1 }
 0x203   : > { %v645_v28 = vadd.f32 %v1140_v27, %v1635_v25  ;;  %v713_v27 = vunpack.c.l.bf16 %v1626_v20 }
 0x204   : > { %v636_v30 = vpop.f32.mrf.mxu1 }
 0x205   : > { %v637_v31 = vadd.f32 %v1635_v25, %v636_v30  ;;  %v717_v35 = vadd.f32 %v701_v29, %v645_v28 }
 0x206   : > { %v1141_v33 = vpop.f32.mrf.mxu1 }
 0x207   : > { %v648_v36 = vadd.f32 %v1141_v33, %v1635_v25  ;;  %v715_v38 = vadd.f32 %v699_v26, %v637_v31  ;;  %v733_v43 = vmax.f32 %v717_v35, 0.0 }
 0x208   : > { %v639_v37 = vpop.f32.mrf.mxu1 }
 0x209   : > { %v718_v39 = vadd.f32 %v702_v32, %v648_v36  ;;  %v640_v40 = vadd.f32 %v1635_v25, %v639_v37  ;;  %v731_v48 = vmax.f32 %v715_v38, 0.0  ;;  %v711_v32 = vunpack.c.l.bf16 %v1621_v19 }
 0x20a   : > { %v1144_v41 = vpop.f32.mrf.mxu1 }
 0x20b   : > { %v734_v44 = vmax.f32 %v718_v39, 0.0  ;;  %v716_v45 = vadd.f32 %v700_v34, %v640_v40  ;;  %v661_v14 = vadd.f32 %v1144_v41, %v1635_v25  ;;  %v712_v41 = vunpack.c.h.bf16 %v1621_v19 }
 0x20c   : > { %v652_v46 = vpop.f32.mrf.mxu1 }
 0x20d   : > { %v1019_v49 = vpack.c.bf16 %v734_v44, %v733_v43  ;;  %v732_v50 = vmax.f32 %v716_v45, 0.0  ;;  %v653_v51 = vadd.f32 %v1635_v25, %v652_v46  ;;  %v721_v54 = vadd.f32 %v705_v42, %v661_v14 }
 0x20e   : > { %v1145_v52 = vpop.f32.mrf.mxu1 }
 0x20f   : > { %1051 = vst [vmem:[%s1652_s12 + $0x8] sm:$0xff] %v1019_v49   ;;  %v1014_v53 = vpack.c.bf16 %v732_v50, %v731_v48  ;;  %v664_v55 = vadd.f32 %v1145_v52, %v1635_v25  ;;  %v719_v16 = vadd.f32 %v703_v4, %v653_v51  ;;  %v737_v62 = vmax.f32 %v721_v54, 0.0 }
 0x210   : > { %v655_v57 = vpop.f32.mrf.mxu1 }
 0x211   : > { %1015 = vst [vmem:[%s1652_s12] sm:$0xff] %v1014_v53   ;;  %v722_v58 = vadd.f32 %v706_v47, %v664_v55  ;;  %v656_v59 = vadd.f32 %v1635_v25, %v655_v57  ;;  %v735_v5 = vmax.f32 %v719_v16, 0.0 }
 0x212   : > { %v1148_v60 = vpop.f32.mrf.mxu1 }
 0x213   : > { %v738_v63 = vmax.f32 %v722_v58, 0.0  ;;  %v720_v0 = vadd.f32 %v704_v56, %v656_v59  ;;  %v677_v1 = vadd.f32 %v1148_v60, %v1635_v25 }
 0x214   : > { %v668_v2 = vpop.f32.mrf.mxu1 }
 0x215   : > { %v1029_v6 = vpack.c.bf16 %v738_v63, %v737_v62  ;;  %v736_v7 = vmax.f32 %v720_v0, 0.0  ;;  %v669_v8 = vadd.f32 %v1635_v25, %v668_v2  ;;  %v725_v11 = vadd.f32 %v709_v61, %v677_v1 }
 0x216   : > { %v1149_v9 = vpop.f32.mrf.mxu1 }
 0x217   : > { %1053 = vst [vmem:[%s1652_s12 + $0x18] sm:$0xff] %v1029_v6   ;;  %v1024_v10 = vpack.c.bf16 %v736_v7, %v735_v5  ;;  %v680_v12 = vadd.f32 %v1149_v9, %v1635_v25  ;;  %v723_v22 = vadd.f32 %v707_v3, %v669_v8  ;;  %v741_v28 = vmax.f32 %v725_v11, 0.0 }
 0x218   : > { %v671_v21 = vpop.f32.mrf.mxu1 }
 0x219   : > { %1052 = vst [vmem:[%s1652_s12 + $0x10] sm:$0xff] %v1024_v10   ;;  %v726_v23 = vadd.f32 %v710_v15, %v680_v12  ;;  %v672_v18 = vadd.f32 %v1635_v25, %v671_v21  ;;  %v739_v33 = vmax.f32 %v723_v22, 0.0 }
 0x21a   : > { %v1152_v24 = vpop.f32.mrf.mxu1 }
 0x21b   : > { %v742_v29 = vmax.f32 %v726_v23, 0.0  ;;  %v724_v30 = vadd.f32 %v708_v13, %v672_v18  ;;  %v693_v26 = vadd.f32 %v1152_v24, %v1635_v25 }
 0x21c   : > { %v684_v31 = vpop.f32.mrf.mxu1 }
 0x21d   : > { %v1039_v34 = vpack.c.bf16 %v742_v29, %v741_v28  ;;  %v740_v35 = vmax.f32 %v724_v30, 0.0  ;;  %v685_v36 = vadd.f32 %v1635_v25, %v684_v31  ;;  %v729_v39 = vadd.f32 %v713_v27, %v693_v26 }
 0x21e   : > { %v1153_v37 = vpop.f32.mrf.mxu1 }
 0x21f   : > { %1055 = vst [vmem:[%s1652_s12 + $0x28] sm:$0xff] %v1039_v34   ;;  %v1034_v38 = vpack.c.bf16 %v740_v35, %v739_v33  ;;  %v696_v40 = vadd.f32 %v1153_v37, %v1635_v25  ;;  %v727_v20 = vadd.f32 %v711_v32, %v685_v36  ;;  %v745_v45 = vmax.f32 %v729_v39, 0.0 }
 0x220   : > { %v687_v42 = vpop.f32.mrf.mxu1 }
 0x221   : > { %1054 = vst [vmem:[%s1652_s12 + $0x20] sm:$0xff] %v1034_v38   ;;  %v730_v43 = vadd.f32 %v714_v17, %v696_v40  ;;  %v688_v44 = vadd.f32 %v1635_v25, %v687_v42  ;;  %v743_v4 = vmax.f32 %v727_v20, 0.0 }
 0x223   : > { %v746_v14 = vmax.f32 %v730_v43, 0.0  ;;  %v728_v46 = vadd.f32 %v712_v41, %v688_v44 }
 0x225   : > { %v1049_v47 = vpack.c.bf16 %v746_v14, %v745_v45  ;;  %v744_v48 = vmax.f32 %v728_v46, 0.0 }
 0x227   : > { %1057 = vst [vmem:[%s1652_s12 + $0x38] sm:$0xff] %v1049_v47   ;;  %v1044_v19 = vpack.c.bf16 %v744_v48, %v743_v4 }
 0x229   : > { %1056 = vst [vmem:[%s1652_s12 + $0x30] sm:$0xff] %v1044_v19  }
 0x22a   : > { %1350 = shalt.err (!%p1347_p3)
}
 0x22b   : > { %s1351_s13 = scalar_lea.hbm %s1684_s11, 1024  ;;  %s1355_s9 = scalar_lea.hbm %s1736_s5, 2048 }
 0x22c   : > { %p1352_p11 = scmp.ne.s32.totalorder %s1684_s11, %s1351_s13  ;;  %p1356_p4 = scmp.lt.s32.totalorder %s1684_s11, %s1736_s5 }
 0x22d   : > { %p1357_p6 = scmp.lt.s32.totalorder %s1355_s9, %s1351_s13 }
 0x22e   : > { %p1353_p9 = pnand %p1352_p11, %p1753_p2 }
 0x22f   : > { %p1358_p8 = por %p1357_p6, %p1356_p4 }
 0x230   : > { %p1354_p1 = pneg %p1353_p9 }
 0x232   : > { %p1359_p5 = pnand %p1358_p8, %p1354_p1 }
 0x234   : > { %1362 = shalt.err (!%p1359_p5)
}
 0x235   : > { %s1413_s14 = smov 64   ;;  %s1414_s7 = smov 4  }
 0x236   : > { %1164 = dma.vmem_to_hbm [thread:$0]  (%p1753_p2), %s1686_s6, 1024, %s1684_s11, %s828_s17, %s1413_s14, %s1413_s14, %s1414_s7  }
 0x237 PF: > { %s856_s28 = sand.u32 1, %s1393_s18   ;;  %p1754_p7 = scmp.ne.s32.totalorder %s1743_s25, 0 }
 0x238   : > { %p1755_p12 = scmp.ge.s32.totalorder %s1405_s21, 2  ;;  %s857_s16 = scalar_lea.sflag [#allocation4], %s856_s28 }
 0x23a   : > { %p1178_p13 = pnand %p1755_p12, %p1754_p7 }
 0x23c   : > { %p1179_p0 = pneg %p1178_p13 }
 0x23e   : > { %1388 = dma.done.wait (%p1179_p0), %s857_s16, 1024  }
 0x23f   : > { %1390 = vsyncadd (%p1179_p0), %s857_s16, 4294966272  ;;  %p19_p10 = scmp.ge.s32.totalorder %s1523_s15, 4   ;;  %s1756_s18 = smov %s1397_s19 }
 0x240   : > { %s1757_s19 = smov %s1401_s20  ;;  %s1758_s20 = smov %s1539_s27 }
 0x241   : > { %s1759_s21 = smov %s1523_s15  ;;  %21 = sbr.rel (!%p19_p10) target bundleno = 6 (0x6), region = 93 }
 0x246   :  { %862 = vsyncpa [#allocation3], 1 }
 0x247   :  { %864 = vsyncpa [#allocation3 + $0x1], 1 }
 0x248   :  { %865 = vsyncpa [#allocation6], 1 }
 0x249   :  { %866 = vsyncpa [#allocation4], 1 }
 0x24a   :  { %868 = vsyncpa [#allocation4 + $0x1], 1 }

</bundles_post_ra>
